<compile_context>
chip_gen: v7x
topology: tpu7x:2x2x1
jax: 0.10.0
libtpu: 0.0.40
codegen_flags: <defaults>
</compile_context>

<pallas_src>
import functools

import jax
import jax.numpy as jnp
from jax.experimental import pallas as pl
from jax.experimental.pallas import tpu as pltpu


def _round_up(x, m):
    return ((x + m - 1) // m) * m


def _make_linear_kernel(use_bf16_inputs):
    def kernel(x_ref, w_ref, b_ref, o_ref):
        k = pl.program_id(2)

        # Output block (i, j) is resident across the k axis -> accumulate in place.
        @pl.when(k == 0)
        def _():
            o_ref[...] = jnp.zeros_like(o_ref)

        xv = x_ref[...]
        wv = w_ref[...]
        if use_bf16_inputs:
            # Opt-in mixed precision: bf16 MXU inputs, f32 accumulation.
            xv = xv.astype(jnp.bfloat16)
            wv = wv.astype(jnp.bfloat16)

        o_ref[...] += jnp.dot(xv, wv, preferred_element_type=jnp.float32)

        # Fuse the bias add on the last K step (b_ref is (1, tn), broadcasts over rows).
        @pl.when(k == pl.num_programs(2) - 1)
        def _():
            o_ref[...] = o_ref[...] + b_ref[...]

    return kernel


@functools.partial(
    jax.jit, static_argnames=("tm", "tn", "tk", "use_bf16_inputs")
)
def sparse_input_linear(x, weight, bias, *, tm=256, tn=512, tk=512,
                        use_bf16_inputs=False):
    M, K = x.shape
    K2, N = weight.shape
    assert K == K2 and bias.shape == (N,)

    # Clamp tile sizes to the (alignment-rounded) array dims.
    #  - tm: sublane axis of x/out blocks -> multiple of 8
    #  - tn: lane axis of weight/out/bias blocks -> multiple of 128
    #  - tk: lane axis of x block / sublane axis of weight block -> multiple of 128
    tm = min(tm, _round_up(M, 8))
    tn = min(tn, _round_up(N, 128))
    tk = min(tk, _round_up(K, 128))

    Mp = _round_up(M, tm)
    Np = _round_up(N, tn)
    Kp = _round_up(K, tk)

    # Zero-pad to tile multiples (padding along K adds zero contributions;
    # padded rows / cols are sliced off the result).
    xp = x if (Mp, Kp) == (M, K) else jnp.pad(x, ((0, Mp - M), (0, Kp - K)))
    wp = weight if (Kp, Np) == (K, N) else jnp.pad(weight, ((0, Kp - K), (0, Np - N)))
    bp = bias if Np == N else jnp.pad(bias, (0, Np - N))
    bias2d = bp.reshape(1, Np)

    grid = (Mp // tm, Np // tn, Kp // tk)

    # Advisory cost estimate for XLA scheduling around the custom call.
    cost = pl.CostEstimate(
        flops=2 * M * N * K,
        transcendentals=0,
        bytes_accessed=4 * (M * K + K * N + M * N + N),
    )

    # Double-buffered inputs + output block; only raise the scoped VMEM limit
    # when the tile footprint actually needs it (keeps v7x's 64 MiB safe).
    elt = 4
    vmem_bytes = 2 * elt * (tm * tk + tk * tn + tn) + 2 * elt * (tm * tn)
    vmem_limit = None
    if vmem_bytes > 24 * 1024 * 1024:
        vmem_limit = min(int(vmem_bytes * 3 // 2), 96 * 1024 * 1024)

    out = pl.pallas_call(
        _make_linear_kernel(use_bf16_inputs),
        out_shape=jax.ShapeDtypeStruct((Mp, Np), jnp.float32),
        grid_spec=pltpu.PrefetchScalarGridSpec(
            num_scalar_prefetch=0,
            grid=grid,
            in_specs=[
                pl.BlockSpec((tm, tk), lambda i, j, k: (i, k)),  # x tile
                pl.BlockSpec((tk, tn), lambda i, j, k: (k, j)),  # weight tile
                pl.BlockSpec((1, tn), lambda i, j, k: (0, j)),   # bias tile
            ],
            out_specs=pl.BlockSpec((tm, tn), lambda i, j, k: (i, j)),
        ),
        compiler_params=pltpu.CompilerParams(
            dimension_semantics=("parallel", "parallel", "arbitrary"),
            vmem_limit_bytes=vmem_limit,
        ),
        cost_estimate=cost,
    )(xp, wp, bias2d)

    if (Mp, Np) != (M, N):
        out = out[:M, :N]
    return out


def init_params(key, inp_dim, out_dim):
    """Deterministic re-implementation of reset_parameters():
    weight, bias ~ Uniform(-stdv, stdv), stdv = 1/sqrt(out_dim)."""
    stdv = 1.0 / jnp.sqrt(jnp.float32(out_dim))
    kw, kb = jax.random.split(key)
    weight = jax.random.uniform(
        kw, (inp_dim, out_dim), dtype=jnp.float32, minval=-stdv, maxval=stdv
    )
    bias = jax.random.uniform(
        kb, (out_dim,), dtype=jnp.float32, minval=-stdv, maxval=stdv
    )
    return weight, bias


if __name__ == "__main__":
    key = jax.random.PRNGKey(0)
    k_x, k_p, k_x2 = jax.random.split(key, 3)

    # Small, tile-aligned demo shapes (collapses to a single grid step).
    num_rows, inp_dim, out_dim = 128, 256, 256
    x = jax.random.normal(k_x, (num_rows, inp_dim), dtype=jnp.float32)
    weight, bias = init_params(k_p, inp_dim, out_dim)

    y = sparse_input_linear(x, weight, bias)
    y = jax.block_until_ready(y)

    y_ref = x @ weight + bias
    assert y.shape == (num_rows, out_dim)
    assert jnp.allclose(y, y_ref, atol=1e-5, rtol=1e-5)

    # Non-tile-multiple shape exercises the padding path.
    x2 = jax.random.normal(k_x2, (37, inp_dim), dtype=jnp.float32)
    y2 = jax.block_until_ready(sparse_input_linear(x2, weight, bias))
    y2_ref = x2 @ weight + bias
    assert jnp.allclose(y2, y2_ref, atol=1e-5, rtol=1e-5)

    print("KERNEL_OK")
</pallas_src>

<mosaic_0001>
module attributes {stable_mosaic.version = 11 : i64} {
  func.func @kernel(%arg0: i32, %arg1: i32, %arg2: i32, %arg3: memref<128x256xf32, #tpu.memory_space<vmem>>, %arg4: memref<256x256xf32, #tpu.memory_space<vmem>>, %arg5: memref<1x256xf32, #tpu.memory_space<vmem>>, %arg6: memref<128x256xf32, #tpu.memory_space<vmem>>) attributes {dimension_semantics = [#tpu.dimension_semantics<parallel>, #tpu.dimension_semantics<parallel>, #tpu.dimension_semantics<arbitrary>], iteration_bounds = array<i64: 1, 1, 1>, scalar_prefetch = 0 : i64, scratch_operands = 0 : i64, tpu.core_type = #tpu.core_type<tc>, window_params = [{transform_indices = @transform_0, window_bounds = array<i64: 128, 256>}, {transform_indices = @transform_1, window_bounds = array<i64: 256, 256>}, {transform_indices = @transform_2, window_bounds = array<i64: 1, 256>}, {transform_indices = @transform_3, window_bounds = array<i64: 128, 256>}]} {
    %c0_i32 = arith.constant 0 : i32
    %0 = arith.cmpi eq, %arg2, %c0_i32 : i32
    %1 = arith.extui %0 : i1 to i32
    %c0_i32_0 = arith.constant 0 : i32
    %2 = arith.cmpi ne, %1, %c0_i32_0 : i32
    scf.if %2 {
      %cst_10 = arith.constant 0.000000e+00 : f32
      %12 = vector.broadcast %cst_10 : f32 to vector<128x256xf32>
      %c0_11 = arith.constant 0 : index
      %c0_12 = arith.constant 0 : index
      %13 = vector.load %arg6[%c0_11, %c0_12] : memref<128x256xf32, #tpu.memory_space<vmem>>, vector<128x256xf32>
      tpu.vector_store %arg6[%c0_11, %c0_12], %12 {strides = array<i32>} : memref<128x256xf32, #tpu.memory_space<vmem>>, vector<128x256xf32>,
    } else {
    }
    %c0 = arith.constant 0 : index
    %c0_1 = arith.constant 0 : index
    %3 = vector.load %arg3[%c0, %c0_1] : memref<128x256xf32, #tpu.memory_space<vmem>>, vector<128x256xf32>
    %c0_2 = arith.constant 0 : index
    %c0_3 = arith.constant 0 : index
    %4 = vector.load %arg4[%c0_2, %c0_3] : memref<256x256xf32, #tpu.memory_space<vmem>>, vector<256x256xf32>
    %c0_4 = arith.constant 0 : index
    %c0_5 = arith.constant 0 : index
    %5 = vector.load %arg6[%c0_4, %c0_5] : memref<128x256xf32, #tpu.memory_space<vmem>>, vector<128x256xf32>
    %cst = arith.constant dense<0.000000e+00> : vector<128x256xf32>
    %6 = tpu.matmul %3, %4, %cst {dimension_numbers = #tpu.dot_dimension_numbers<[1], [0], [0], [1], [0, 0, 1, 1], [], []>} : vector<128x256xf32>, vector<256x256xf32>, vector<128x256xf32> -> vector<128x256xf32>
    %7 = arith.addf %5, %6 : vector<128x256xf32>
    %c0_6 = arith.constant 0 : index
    %c0_7 = arith.constant 0 : index
    %8 = vector.load %arg6[%c0_6, %c0_7] : memref<128x256xf32, #tpu.memory_space<vmem>>, vector<128x256xf32>
    tpu.vector_store %arg6[%c0_6, %c0_7], %7 {strides = array<i32>} : memref<128x256xf32, #tpu.memory_space<vmem>>, vector<128x256xf32>,
    %c0_i32_8 = arith.constant 0 : i32
    %9 = arith.cmpi eq, %arg2, %c0_i32_8 : i32
    %10 = arith.extui %9 : i1 to i32
    %c0_i32_9 = arith.constant 0 : i32
    %11 = arith.cmpi ne, %10, %c0_i32_9 : i32
    scf.if %11 {
      %c0_10 = arith.constant 0 : index
      %c0_11 = arith.constant 0 : index
      %12 = vector.load %arg6[%c0_10, %c0_11] : memref<128x256xf32, #tpu.memory_space<vmem>>, vector<128x256xf32>
      %c0_12 = arith.constant 0 : index
      %c0_13 = arith.constant 0 : index
      %13 = vector.load %arg5[%c0_12, %c0_13] : memref<1x256xf32, #tpu.memory_space<vmem>>, vector<1x256xf32>
      %14 = vector.broadcast %13 : vector<1x256xf32> to vector<128x256xf32>
      %15 = arith.addf %12, %14 : vector<128x256xf32>
      %c0_14 = arith.constant 0 : index
      %c0_15 = arith.constant 0 : index
      %16 = vector.load %arg6[%c0_14, %c0_15] : memref<128x256xf32, #tpu.memory_space<vmem>>, vector<128x256xf32>
      tpu.vector_store %arg6[%c0_14, %c0_15], %15 {strides = array<i32>} : memref<128x256xf32, #tpu.memory_space<vmem>>, vector<128x256xf32>,
    } else {
    }
    return
  }
  func.func @transform_0(%arg0: i32, %arg1: i32, %arg2: i32) -> (i32, i32) {
    %c0_i32 = arith.constant 0 : i32
    return %arg0, %arg2 : i32, i32
  }
  func.func @transform_1(%arg0: i32, %arg1: i32, %arg2: i32) -> (i32, i32) {
    %c0_i32 = arith.constant 0 : i32
    return %arg2, %arg1 : i32, i32
  }
  func.func @transform_2(%arg0: i32, %arg1: i32, %arg2: i32) -> (i32, i32) {
    %c0_i32 = arith.constant 0 : i32
    %c0_i32_0 = arith.constant 0 : i32
    return %c0_i32, %arg1 : i32, i32
  }
  func.func @transform_3(%arg0: i32, %arg1: i32, %arg2: i32) -> (i32, i32) {
    %c0_i32 = arith.constant 0 : i32
    return %arg0, %arg1 : i32, i32
  }
}

</mosaic_0001>

<bundles_post_ra>
// kernel: sparse_input_linear.1
= control target key start
LH: loop header
LB: loop body
LE: loop exit
PB: predicated region body
PF: predicated region fallthrough
CT: control target
= control target key end

     0   :  { %8 = vsyncpa [#allocation3], 0  ;;  %s844_s0 = inlined_call_operand.hbm [shape: f32[128,256], index: 0, kind: input, shape index: {}]   ;;  %s845_s1 = inlined_call_operand.hbm [shape: f32[256,256], index: 1, kind: input, shape index: {}]   ;;  %s846_s2 = inlined_call_operand.vmem [shape: f32[1,256], index: 2, kind: input, shape index: {}]   ;;  %s847_s3 = inlined_call_operand.hbm [shape: f32[128,256], index: 3, kind: output, shape index: {}]  }
   0x1   :  { %9 = vsyncpa [#allocation6], 0 }
   0x2   :  { %10 = vsyncpa [#allocation4], 0  ;;  %s735_s12 = smov [#allocation2]   ;;  %s663_s16 = scalar_lea.hbm %s844_s0, 4096 }
   0x3   :  { %s16_s13 = sshll.u32 %s735_s12, 4  ;;  %p664_p0 = scmp.ne.s32.totalorder %s844_s0, %s663_s16  ;;  %s17_s13 = int_to_ptr.vmem [resolvable:$true] %s16_s13 }
   0x4   :  { %p667_p1 = scmp.lt.u32.totalorder %s663_s16, %s844_s0 }
   0x6   :  { %p669_p2 = pnand %p667_p1, %p664_p0 }
   0x8   :  { %672 = shalt.err (!%p669_p2)
}
   0x9   :  { %s673_s21 = scalar_lea.vmem %s17_s13, 4096  ;;  %p678_p4 = scmp.lt.s32.totalorder %s17_s13, %s17_s13 }
   0xa   :  { %p674_p3 = scmp.ne.s32.totalorder %s17_s13, %s673_s21  ;;  %p679_p5 = scmp.lt.s32.totalorder %s673_s21, %s673_s21 }
   0xc   :  { %p680_p6 = por %p679_p5, %p678_p4 }
   0xe   :  { %p681_p7 = pnand %p680_p6, %p674_p3 }
  0x10   :  { %684 = shalt.err (!%p681_p7)
}
  0x11   :  { %s736_s22 = smov 256   ;;  %s737_s23 = smov 16  }
  0x12   :  { %22 = dma.hbm_to_vmem [thread:$0]  %s844_s0, 4096, %s17_s13, [#allocation3], %s736_s22, %s736_s22, %s737_s23  }
  0x13   :  { %s738_s26 = smov [#allocation5]   ;;  %s685_s30 = scalar_lea.hbm %s845_s1, 8192 }
  0x14   :  { %s28_s27 = sshll.u32 %s738_s26, 4  ;;  %p686_p8 = scmp.ne.s32.totalorder %s845_s1, %s685_s30  ;;  %s29_s27 = int_to_ptr.vmem [resolvable:$true] %s28_s27 }
  0x15   :  { %p689_p9 = scmp.lt.u32.totalorder %s685_s30, %s845_s1 }
  0x17   :  { %p691_p10 = pnand %p689_p9, %p686_p8 }
  0x19   :  { %694 = shalt.err (!%p691_p10)
}
  0x1a   :  { %s695_s8 = scalar_lea.vmem %s29_s27, 8192  ;;  %p700_p12 = scmp.lt.s32.totalorder %s29_s27, %s29_s27 }
  0x1b   :  { %p696_p11 = scmp.ne.s32.totalorder %s29_s27, %s695_s8  ;;  %p701_p13 = scmp.lt.s32.totalorder %s695_s8, %s695_s8 }
  0x1d   :  { %p702_p0 = por %p701_p13, %p700_p12 }
  0x1f   :  { %p703_p1 = pnand %p702_p0, %p696_p11 }
  0x21   :  { %706 = shalt.err (!%p703_p1)
}
  0x22   :  { %34 = dma.hbm_to_vmem [thread:$0]  %s845_s1, 8192, %s29_s27, [#allocation6], %s736_s22, %s736_s22, %s737_s23  }
  0x23   :  { %729 = dma.done.wait [#allocation3], 4096  }
  0x24   :  { %730 = vsyncadd [#allocation3], 4294963200 }
  0x25   :  { %731 = dma.done.wait [#allocation6], 8192  }
  0x26   :  { %732 = vsyncadd [#allocation6], 4294959104  ;;  %v112_v0 = vld [vmem:[#allocation5 + $0x8] sm:$0xff]  ;;  %v114_v1 = vld [vmem:[#allocation5 + $0x18] sm:$0xff] }
  0x27   :  { %v111_v2 = vld [vmem:[#allocation5] sm:$0xff]  ;;  %v561_v3 = vpack.c.bf16 %v114_v1, %v112_v0  ;;  %v113_v4 = vld [vmem:[#allocation5 + $0x10] sm:$0xff]  ;;  %v116_v5 = vld [vmem:[#allocation5 + $0x28] sm:$0xff] }
  0x28   :  { %v118_v6 = vld [vmem:[#allocation5 + $0x38] sm:$0xff]  ;;  %v563_v7 = vpack.c.bf16 %v113_v4, %v111_v2  ;;  %v115_v9 = vld [vmem:[#allocation5 + $0x20] sm:$0xff]  ;;  %v117_v10 = vld [vmem:[#allocation5 + $0x30] sm:$0xff] }
  0x29   :  { %v565_v8 = vpack.c.bf16 %v118_v6, %v116_v5  ;;  %v120_v11 = vld [vmem:[#allocation5 + $0x48] sm:$0xff]  ;;  %562 = vmatprep.subr.bf16.mxu0 %v561_v3  ;;  %625 = vmatprep.subr.bf16.mxu1 %v561_v3  ;;  %v122_v12 = vld [vmem:[#allocation5 + $0x58] sm:$0xff]  ;;  %v567_v13 = vpack.c.bf16 %v117_v10, %v115_v9  ;;  %v119_v15 = vld [vmem:[#allocation5 + $0x40] sm:$0xff] }
  0x2a   :  { %564 = vmatpush1.bf16.msra.mxu0 %v563_v7  ;;  %641 = vmatpush1.bf16.msra.mxu1 %v563_v7  ;;  %v569_v14 = vpack.c.bf16 %v122_v12, %v120_v11  ;;  %v121_v16 = vld [vmem:[#allocation5 + $0x50] sm:$0xff]  ;;  %v124_v17 = vld [vmem:[#allocation5 + $0x68] sm:$0xff]  ;;  %v126_v18 = vld [vmem:[#allocation5 + $0x78] sm:$0xff] }
  0x2b   :  { %566 = vmatprep.subr.bf16.mxu0 %v565_v8  ;;  %626 = vmatprep.subr.bf16.mxu1 %v565_v8  ;;  %v571_v19 = vpack.c.bf16 %v121_v16, %v119_v15  ;;  %v573_v20 = vpack.c.bf16 %v126_v18, %v124_v17  ;;  %v123_v21 = vld [vmem:[#allocation5 + $0x60] sm:$0xff]  ;;  %v125_v22 = vld [vmem:[#allocation5 + $0x70] sm:$0xff]  ;;  %v128_v23 = vld [vmem:[#allocation5 + $0x88] sm:$0xff] }
  0x2c   :  { %v130_v24 = vld [vmem:[#allocation5 + $0x98] sm:$0xff]  ;;  %v575_v25 = vpack.c.bf16 %v125_v22, %v123_v21  ;;  %v127_v27 = vld [vmem:[#allocation5 + $0x80] sm:$0xff]  ;;  %v129_v28 = vld [vmem:[#allocation5 + $0x90] sm:$0xff] }
  0x2d   :  { %v577_v26 = vpack.c.bf16 %v130_v24, %v128_v23  ;;  %v132_v29 = vld [vmem:[#allocation5 + $0xa8] sm:$0xff]  ;;  %v134_v30 = vld [vmem:[#allocation5 + $0xb8] sm:$0xff]  ;;  %v579_v31 = vpack.c.bf16 %v129_v28, %v127_v27  ;;  %v131_v33 = vld [vmem:[#allocation5 + $0xa0] sm:$0xff] }
  0x2e   :  { %568 = vmatpush1.bf16.msra.mxu0 %v567_v13  ;;  %642 = vmatpush1.bf16.msra.mxu1 %v567_v13  ;;  %v581_v32 = vpack.c.bf16 %v134_v30, %v132_v29  ;;  %v133_v34 = vld [vmem:[#allocation5 + $0xb0] sm:$0xff]  ;;  %v136_v35 = vld [vmem:[#allocation5 + $0xc8] sm:$0xff]  ;;  %v138_v36 = vld [vmem:[#allocation5 + $0xd8] sm:$0xff] }
  0x2f   :  { %570 = vmatprep.subr.bf16.mxu0 %v569_v14  ;;  %627 = vmatprep.subr.bf16.mxu1 %v569_v14  ;;  %v583_v37 = vpack.c.bf16 %v133_v34, %v131_v33  ;;  %v135_v38 = vld [vmem:[#allocation5 + $0xc0] sm:$0xff]  ;;  %v585_v39 = vpack.c.bf16 %v138_v36, %v136_v35  ;;  %v137_v40 = vld [vmem:[#allocation5 + $0xd0] sm:$0xff]  ;;  %v80_v41 = vld [vmem:[#allocation2 + $0x8] sm:$0xff] }
  0x30   :  { %v96_v42 = vld [vmem:[#allocation2 + $0x88] sm:$0xff]  ;;  %v142_v44 = vld [vmem:[#allocation5 + $0xf8] sm:$0xff]  ;;  %271 = vmatprep.mubr.f32.mxu0 %v80_v41  ;;  %v587_v45 = vpack.c.bf16 %v137_v40, %v135_v38  ;;  %v139_v47 = vld [vmem:[#allocation5 + $0xe0] sm:$0xff] }
  0x31   :  { %v140_v43 = vld [vmem:[#allocation5 + $0xe8] sm:$0xff]  ;;  %319 = vmatprep.mubr.f32.mxu1 %v96_v42  ;;  %v141_v48 = vld [vmem:[#allocation5 + $0xf0] sm:$0xff]  ;;  %v146_v50 = vld [vmem:[#allocation5 + $0x118] sm:$0xff] }
  0x32   :  { %572 = vmatpush1.bf16.msra.mxu0 %v571_v19  ;;  %643 = vmatpush1.bf16.msra.mxu1 %v571_v19  ;;  %v589_v46 = vpack.c.bf16 %v142_v44, %v140_v43  ;;  %v144_v49 = vld [vmem:[#allocation5 + $0x108] sm:$0xff]  ;;  %v591_v51 = vpack.c.bf16 %v141_v48, %v139_v47  ;;  %v143_v53 = vld [vmem:[#allocation5 + $0x100] sm:$0xff]  ;;  %v145_v54 = vld [vmem:[#allocation5 + $0x110] sm:$0xff] }
  0x33   :  { %574 = vmatprep.subr.bf16.mxu0 %v573_v20  ;;  %628 = vmatprep.subr.bf16.mxu1 %v573_v20  ;;  %v593_v52 = vpack.c.bf16 %v146_v50, %v144_v49  ;;  %v148_v55 = vld [vmem:[#allocation5 + $0x128] sm:$0xff]  ;;  %v150_v56 = vld [vmem:[#allocation5 + $0x138] sm:$0xff]  ;;  %v595_v57 = vpack.c.bf16 %v145_v54, %v143_v53  ;;  %v147_v59 = vld [vmem:[#allocation5 + $0x120] sm:$0xff] }
  0x34   :  { %v597_v58 = vpack.c.bf16 %v150_v56, %v148_v55  ;;  %v149_v60 = vld [vmem:[#allocation5 + $0x130] sm:$0xff]  ;;  %v152_v61 = vld [vmem:[#allocation5 + $0x148] sm:$0xff]  ;;  %v154_v62 = vld [vmem:[#allocation5 + $0x158] sm:$0xff] }
  0x35   :  { %v599_v63 = vpack.c.bf16 %v149_v60, %v147_v59  ;;  %v601_v0 = vpack.c.bf16 %v154_v62, %v152_v61  ;;  %v151_v1 = vld [vmem:[#allocation5 + $0x140] sm:$0xff]  ;;  %v153_v2 = vld [vmem:[#allocation5 + $0x150] sm:$0xff]  ;;  %v156_v3 = vld [vmem:[#allocation5 + $0x168] sm:$0xff] }
  0x36   :  { %576 = vmatpush1.bf16.msra.mxu0 %v575_v25  ;;  %644 = vmatpush1.bf16.msra.mxu1 %v575_v25  ;;  %v158_v4 = vld [vmem:[#allocation5 + $0x178] sm:$0xff]  ;;  %v603_v5 = vpack.c.bf16 %v153_v2, %v151_v1  ;;  %v155_v7 = vld [vmem:[#allocation5 + $0x160] sm:$0xff]  ;;  %v157_v8 = vld [vmem:[#allocation5 + $0x170] sm:$0xff] }
  0x37   :  { %578 = vmatprep.subr.bf16.mxu0 %v577_v26  ;;  %629 = vmatprep.subr.bf16.mxu1 %v577_v26  ;;  %v605_v6 = vpack.c.bf16 %v158_v4, %v156_v3  ;;  %v160_v9 = vld [vmem:[#allocation5 + $0x188] sm:$0xff]  ;;  %v162_v10 = vld [vmem:[#allocation5 + $0x198] sm:$0xff]  ;;  %v607_v11 = vpack.c.bf16 %v157_v8, %v155_v7  ;;  %v159_v13 = vld [vmem:[#allocation5 + $0x180] sm:$0xff] }
  0x38   :  { %v609_v12 = vpack.c.bf16 %v162_v10, %v160_v9  ;;  %v161_v14 = vld [vmem:[#allocation5 + $0x190] sm:$0xff]  ;;  %v164_v15 = vld [vmem:[#allocation5 + $0x1a8] sm:$0xff]  ;;  %v166_v16 = vld [vmem:[#allocation5 + $0x1b8] sm:$0xff] }
  0x39   :  { %v611_v17 = vpack.c.bf16 %v161_v14, %v159_v13  ;;  %v613_v18 = vpack.c.bf16 %v166_v16, %v164_v15  ;;  %v163_v19 = vld [vmem:[#allocation5 + $0x1a0] sm:$0xff]  ;;  %v165_v20 = vld [vmem:[#allocation5 + $0x1b0] sm:$0xff]  ;;  %v168_v21 = vld [vmem:[#allocation5 + $0x1c8] sm:$0xff] }
  0x3a   :  { %580 = vmatpush1.bf16.msra.mxu0 %v579_v31  ;;  %645 = vmatpush1.bf16.msra.mxu1 %v579_v31  ;;  %v170_v22 = vld [vmem:[#allocation5 + $0x1d8] sm:$0xff]  ;;  %v615_v23 = vpack.c.bf16 %v165_v20, %v163_v19  ;;  %v167_v25 = vld [vmem:[#allocation5 + $0x1c0] sm:$0xff]  ;;  %v169_v26 = vld [vmem:[#allocation5 + $0x1d0] sm:$0xff] }
  0x3b   :  { %582 = vmatprep.subr.bf16.mxu0 %v581_v32  ;;  %630 = vmatprep.subr.bf16.mxu1 %v581_v32  ;;  %v617_v24 = vpack.c.bf16 %v170_v22, %v168_v21  ;;  %v172_v27 = vld [vmem:[#allocation5 + $0x1e8] sm:$0xff]  ;;  %v174_v28 = vld [vmem:[#allocation5 + $0x1f8] sm:$0xff]  ;;  %v619_v29 = vpack.c.bf16 %v169_v26, %v167_v25  ;;  %v171_v31 = vld [vmem:[#allocation5 + $0x1e0] sm:$0xff] }
  0x3c   :  { %v621_v30 = vpack.c.bf16 %v174_v28, %v172_v27  ;;  %v173_v32 = vld [vmem:[#allocation5 + $0x1f0] sm:$0xff]  ;;  %v79_v34 = vld [vmem:[#allocation2] sm:$0xff]  ;;  %v82_v36 = vld [vmem:[#allocation2 + $0x18] sm:$0xff] }
  0x3d   :  { %v623_v33 = vpack.c.bf16 %v173_v32, %v171_v31  ;;  %v95_v35 = vld [vmem:[#allocation2 + $0x80] sm:$0xff]  ;;  %v81_v38 = vld [vmem:[#allocation2 + $0x10] sm:$0xff]  ;;  %v84_v40 = vld [vmem:[#allocation2 + $0x28] sm:$0xff] }
  0x3e   :  { %584 = vmatpush1.bf16.msra.mxu0 %v583_v37  ;;  %646 = vmatpush1.bf16.msra.mxu1 %v583_v37  ;;  %v98_v37 = vld [vmem:[#allocation2 + $0x98] sm:$0xff]  ;;  %v100_v41 = vld [vmem:[#allocation2 + $0xa8] sm:$0xff]  ;;  %v83_v42 = vld [vmem:[#allocation2 + $0x20] sm:$0xff] }
  0x3f   :  { %586 = vmatprep.subr.bf16.mxu0 %v585_v39  ;;  %631 = vmatprep.subr.bf16.mxu1 %v585_v39  ;;  %v97_v39 = vld [vmem:[#allocation2 + $0x90] sm:$0xff]  ;;  %v99_v43 = vld [vmem:[#allocation2 + $0xa0] sm:$0xff]  ;;  %v86_v44 = vld [vmem:[#allocation2 + $0x38] sm:$0xff] }
  0x40   :  { %v101_v47 = vld [vmem:[#allocation2 + $0xb0] sm:$0xff]  ;;  %v88_v48 = vld [vmem:[#allocation2 + $0x48] sm:$0xff]  ;;  %v87_v50 = vld [vmem:[#allocation2 + $0x40] sm:$0xff] }
  0x41   :  { %v104_v49 = vld [vmem:[#allocation2 + $0xc8] sm:$0xff]  ;;  %v106_v53 = vld [vmem:[#allocation2 + $0xd8] sm:$0xff]  ;;  %v89_v54 = vld [vmem:[#allocation2 + $0x50] sm:$0xff] }
  0x42   :  { %588 = vmatpush1.bf16.msra.mxu0 %v587_v45  ;;  %647 = vmatpush1.bf16.msra.mxu1 %v587_v45  ;;  %v102_v45 = vld [vmem:[#allocation2 + $0xb8] sm:$0xff]  ;;  %v105_v55 = vld [vmem:[#allocation2 + $0xd0] sm:$0xff]  ;;  %v92_v56 = vld [vmem:[#allocation2 + $0x68] sm:$0xff] }
  0x43   :  { %590 = vmatprep.subr.bf16.mxu0 %v589_v46  ;;  %632 = vmatprep.subr.bf16.mxu1 %v589_v46  ;;  %v85_v46 = vld [vmem:[#allocation2 + $0x30] sm:$0xff]  ;;  %v107_v59 = vld [vmem:[#allocation2 + $0xe0] sm:$0xff]  ;;  %v94_v60 = vld [vmem:[#allocation2 + $0x78] sm:$0xff] }
  0x44   :  { %v110_v61 = vld [vmem:[#allocation2 + $0xf8] sm:$0xff]  ;;  %v93_v62 = vld [vmem:[#allocation2 + $0x70] sm:$0xff]  ;;  %v467_v3 = vld [vmem:[%s846_s2] sm:$0x3]  ;;  %s739_s2 = smov [#allocation7]  }
  0x45   :  { %s548_s11 = sshll.u32 %s739_s2, 4  ;;  %s549_s11 = int_to_ptr.vmem [resolvable:$true] %s548_s11 }
  0x46   :  { %592 = vmatpush1.bf16.msra.mxu0 %v591_v51  ;;  %648 = vmatpush1.bf16.msra.mxu1 %v591_v51  ;;  %v103_v51 = vld [vmem:[#allocation2 + $0xc0] sm:$0xff]  ;;  %s707_s12 = scalar_lea.vmem %s549_s11, 4096  ;;  %p712_p3 = scmp.lt.s32.totalorder %s549_s11, %s549_s11 }
  0x47   :  { %594 = vmatprep.subr.bf16.mxu0 %v593_v52  ;;  %633 = vmatprep.subr.bf16.mxu1 %v593_v52  ;;  %v90_v52 = vld [vmem:[#allocation2 + $0x58] sm:$0xff]  ;;  %p708_p2 = scmp.ne.s32.totalorder %s549_s11, %s707_s12  ;;  %p713_p4 = scmp.lt.s32.totalorder %s707_s12, %s707_s12 }
  0x49   :  { %p714_p5 = por %p713_p4, %p712_p3 }
  0x4a   :  { %596 = vmatpush1.bf16.msra.mxu0 %v595_v57  ;;  %649 = vmatpush1.bf16.msra.mxu1 %v595_v57  ;;  %v108_v57 = vld [vmem:[#allocation2 + $0xe8] sm:$0xff] }
  0x4b   :  { %598 = vmatprep.subr.bf16.mxu0 %v597_v58  ;;  %634 = vmatprep.subr.bf16.mxu1 %v597_v58  ;;  %v91_v58 = vld [vmem:[#allocation2 + $0x60] sm:$0xff]  ;;  %p715_p6 = pnand %p714_p5, %p708_p2 }
  0x4e   :  { %600 = vmatpush1.bf16.msra.mxu0 %v599_v63  ;;  %650 = vmatpush1.bf16.msra.mxu1 %v599_v63  ;;  %v109_v63 = vld [vmem:[#allocation2 + $0xf0] sm:$0xff] }
  0x4f   :  { %602 = vmatprep.subr.bf16.mxu0 %v601_v0  ;;  %635 = vmatprep.subr.bf16.mxu1 %v601_v0  ;;  %v469_v0 = vlaneseq }
  0x51   :  { %v470_v1 = vshrl.u32 %v469_v0, 7 }
  0x52   :  { %604 = vmatpush1.bf16.msra.mxu0 %v603_v5  ;;  %651 = vmatpush1.bf16.msra.mxu1 %v603_v5 }
  0x53   :  { %606 = vmatprep.subr.bf16.mxu0 %v605_v6  ;;  %636 = vmatprep.subr.bf16.mxu1 %v605_v6  ;;  %v471_v2 = vsub.s32 0, %v470_v1  ;;  %v475_v4 = vsub.s32 1, %v470_v1 }
  0x55   :  { %v793_v5 = vrot.slane %v467_v3, %v471_v2  ;;  %v795_v8 = vrot.slane %v467_v3, %v475_v4 }
  0x56   :  { %608 = vmatpush1.bf16.msra.mxu0 %v607_v11  ;;  %652 = vmatpush1.bf16.msra.mxu1 %v607_v11 }
  0x57   :  { %610 = vmatprep.subr.bf16.mxu0 %v609_v12  ;;  %637 = vmatprep.subr.bf16.mxu1 %v609_v12 }
  0x5a   :  { %612 = vmatpush1.bf16.msra.mxu0 %v611_v17  ;;  %653 = vmatpush1.bf16.msra.mxu1 %v611_v17 }
  0x5b   :  { %614 = vmatprep.subr.bf16.mxu0 %v613_v18  ;;  %638 = vmatprep.subr.bf16.mxu1 %v613_v18 }
  0x5e   :  { %616 = vmatpush1.bf16.msra.mxu0 %v615_v23  ;;  %654 = vmatpush1.bf16.msra.mxu1 %v615_v23 }
  0x5f   :  { %618 = vmatprep.subr.bf16.mxu0 %v617_v24  ;;  %639 = vmatprep.subr.bf16.mxu1 %v617_v24 }
  0x62   :  { %620 = vmatpush1.bf16.msra.mxu0 %v619_v29  ;;  %655 = vmatpush1.bf16.msra.mxu1 %v619_v29 }
  0x63   :  { %622 = vmatprep.subr.bf16.mxu0 %v621_v30  ;;  %640 = vmatprep.subr.bf16.mxu1 %v621_v30 }
  0x66   :  { %624 = vmatpush1.bf16.msra.mxu0 %v623_v33  ;;  %656 = vmatpush1.bf16.msra.mxu1 %v623_v33 }
  0x69   :  { %272 = vmatmul.mubr.f32.vlgmr.msra.gmra.mrb[0].mxu0 %v79_v34  ;;  %320 = vmatmul.mubr.f32.vlgmr.msra.gmra.mrb[0].mxu1 %v95_v35 }
  0x6a   :  { %277 = vmatprep.mubr.f32.mxu0 %v82_v36  ;;  %325 = vmatprep.mubr.f32.mxu1 %v98_v37 }
  0x6d   :  { %278 = vmatmul.mubr.f32.gmra.mrb[2].mxu0 %v81_v38  ;;  %326 = vmatmul.mubr.f32.gmra.mrb[2].mxu1 %v97_v39 }
  0x6e   :  { %283 = vmatprep.mubr.f32.mxu0 %v84_v40  ;;  %331 = vmatprep.mubr.f32.mxu1 %v100_v41 }
  0x71   :  { %284 = vmatmul.mubr.f32.gmra.mrb[4].mxu0 %v83_v42  ;;  %332 = vmatmul.mubr.f32.gmra.mrb[4].mxu1 %v99_v43 }
  0x72   :  { %289 = vmatprep.mubr.f32.mxu0 %v86_v44  ;;  %337 = vmatprep.mubr.f32.mxu1 %v102_v45 }
  0x75   :  { %290 = vmatmul.mubr.f32.gmra.mrb[6].mxu0 %v85_v46  ;;  %338 = vmatmul.mubr.f32.gmra.mrb[6].mxu1 %v101_v47 }
  0x76   :  { %295 = vmatprep.mubr.f32.mxu0 %v88_v48  ;;  %343 = vmatprep.mubr.f32.mxu1 %v104_v49 }
  0x79   :  { %296 = vmatmul.mubr.f32.gmra.mrb[8].mxu0 %v87_v50  ;;  %344 = vmatmul.mubr.f32.gmra.mrb[8].mxu1 %v103_v51 }
  0x7a   :  { %301 = vmatprep.mubr.f32.mxu0 %v90_v52  ;;  %349 = vmatprep.mubr.f32.mxu1 %v106_v53 }
  0x7d   :  { %302 = vmatmul.mubr.f32.gmra.mrb[10].mxu0 %v89_v54  ;;  %350 = vmatmul.mubr.f32.gmra.mrb[10].mxu1 %v105_v55 }
  0x7e   :  { %307 = vmatprep.mubr.f32.mxu0 %v92_v56  ;;  %355 = vmatprep.mubr.f32.mxu1 %v108_v57 }
  0x81   :  { %308 = vmatmul.mubr.f32.gmra.mrb[12].mxu0 %v91_v58  ;;  %356 = vmatmul.mubr.f32.gmra.mrb[12].mxu1 %v107_v59 }
  0x82   :  { %313 = vmatprep.mubr.f32.mxu0 %v94_v60  ;;  %361 = vmatprep.mubr.f32.mxu1 %v110_v61 }
  0x85   :  { %314 = vmatmul.mubr.f32.gmra.mrb[14].mxu0 %v93_v62  ;;  %362 = vmatmul.mubr.f32.gmra.mrb[14].mxu1 %v109_v63 }
 0x13c   :  { %v273_v6 = vpop.f32.mrb[0].mxu0  ;;  %v321_v7 = vpop.f32.mrb[0].mxu1 }
 0x13d   :  { %v275_v9 = vpop.f32.mrb[1].mxu0  ;;  %v323_v10 = vpop.f32.mrb[1].mxu1  ;;  %v479_v11 = vadd.f32 %v793_v5, %v273_v6  ;;  %v495_v12 = vadd.f32 %v793_v5, %v321_v7 }
 0x13e   :  { %v480_v13 = vadd.f32 %v795_v8, %v275_v9  ;;  %v496_v14 = vadd.f32 %v795_v8, %v323_v10 }
 0x13f   :  { %511 = vst [vmem:[#allocation7] sm:$0xff] %v479_v11  ;;  %527 = vst [vmem:[#allocation7 + $0x80] sm:$0xff] %v495_v12 }
 0x140   :  { %v279_v15 = vpop.f32.mrb[2].mxu0  ;;  %v327_v16 = vpop.f32.mrb[2].mxu1  ;;  %512 = vst [vmem:[#allocation7 + $0x8] sm:$0xff] %v480_v13  ;;  %528 = vst [vmem:[#allocation7 + $0x88] sm:$0xff] %v496_v14 }
 0x141   :  { %v281_v17 = vpop.f32.mrb[3].mxu0  ;;  %v329_v18 = vpop.f32.mrb[3].mxu1  ;;  %v481_v19 = vadd.f32 %v793_v5, %v279_v15  ;;  %v497_v20 = vadd.f32 %v793_v5, %v327_v16 }
 0x142   :  { %v482_v21 = vadd.f32 %v795_v8, %v281_v17  ;;  %v498_v22 = vadd.f32 %v795_v8, %v329_v18 }
 0x143   :  { %513 = vst [vmem:[#allocation7 + $0x10] sm:$0xff] %v481_v19  ;;  %529 = vst [vmem:[#allocation7 + $0x90] sm:$0xff] %v497_v20 }
 0x144   :  { %v285_v23 = vpop.f32.mrb[4].mxu0  ;;  %v333_v24 = vpop.f32.mrb[4].mxu1  ;;  %514 = vst [vmem:[#allocation7 + $0x18] sm:$0xff] %v482_v21  ;;  %530 = vst [vmem:[#allocation7 + $0x98] sm:$0xff] %v498_v22 }
 0x145   :  { %v287_v25 = vpop.f32.mrb[5].mxu0  ;;  %v335_v26 = vpop.f32.mrb[5].mxu1  ;;  %v483_v27 = vadd.f32 %v793_v5, %v285_v23  ;;  %v499_v28 = vadd.f32 %v793_v5, %v333_v24 }
 0x146   :  { %v484_v29 = vadd.f32 %v795_v8, %v287_v25  ;;  %v500_v30 = vadd.f32 %v795_v8, %v335_v26 }
 0x147   :  { %515 = vst [vmem:[#allocation7 + $0x20] sm:$0xff] %v483_v27  ;;  %531 = vst [vmem:[#allocation7 + $0xa0] sm:$0xff] %v499_v28 }
 0x148   :  { %v291_v31 = vpop.f32.mrb[6].mxu0  ;;  %v339_v32 = vpop.f32.mrb[6].mxu1  ;;  %516 = vst [vmem:[#allocation7 + $0x28] sm:$0xff] %v484_v29  ;;  %532 = vst [vmem:[#allocation7 + $0xa8] sm:$0xff] %v500_v30 }
 0x149   :  { %v293_v33 = vpop.f32.mrb[7].mxu0  ;;  %v341_v34 = vpop.f32.mrb[7].mxu1  ;;  %v485_v35 = vadd.f32 %v793_v5, %v291_v31  ;;  %v501_v36 = vadd.f32 %v793_v5, %v339_v32 }
 0x14a   :  { %v486_v37 = vadd.f32 %v795_v8, %v293_v33  ;;  %v502_v38 = vadd.f32 %v795_v8, %v341_v34 }
 0x14b   :  { %517 = vst [vmem:[#allocation7 + $0x30] sm:$0xff] %v485_v35  ;;  %533 = vst [vmem:[#allocation7 + $0xb0] sm:$0xff] %v501_v36 }
 0x14c   :  { %v297_v39 = vpop.f32.mrb[8].mxu0  ;;  %v345_v40 = vpop.f32.mrb[8].mxu1  ;;  %518 = vst [vmem:[#allocation7 + $0x38] sm:$0xff] %v486_v37  ;;  %534 = vst [vmem:[#allocation7 + $0xb8] sm:$0xff] %v502_v38 }
 0x14d   :  { %v299_v41 = vpop.f32.mrb[9].mxu0  ;;  %v347_v42 = vpop.f32.mrb[9].mxu1  ;;  %v487_v43 = vadd.f32 %v793_v5, %v297_v39  ;;  %v503_v44 = vadd.f32 %v793_v5, %v345_v40 }
 0x14e   :  { %v488_v45 = vadd.f32 %v795_v8, %v299_v41  ;;  %v504_v46 = vadd.f32 %v795_v8, %v347_v42 }
 0x14f   :  { %519 = vst [vmem:[#allocation7 + $0x40] sm:$0xff] %v487_v43  ;;  %535 = vst [vmem:[#allocation7 + $0xc0] sm:$0xff] %v503_v44 }
 0x150   :  { %v303_v47 = vpop.f32.mrb[10].mxu0  ;;  %v351_v48 = vpop.f32.mrb[10].mxu1  ;;  %520 = vst [vmem:[#allocation7 + $0x48] sm:$0xff] %v488_v45  ;;  %536 = vst [vmem:[#allocation7 + $0xc8] sm:$0xff] %v504_v46 }
 0x151   :  { %v305_v49 = vpop.f32.mrb[11].mxu0  ;;  %v353_v50 = vpop.f32.mrb[11].mxu1  ;;  %v489_v51 = vadd.f32 %v793_v5, %v303_v47  ;;  %v505_v52 = vadd.f32 %v793_v5, %v351_v48 }
 0x152   :  { %v490_v53 = vadd.f32 %v795_v8, %v305_v49  ;;  %v506_v54 = vadd.f32 %v795_v8, %v353_v50 }
 0x153   :  { %521 = vst [vmem:[#allocation7 + $0x50] sm:$0xff] %v489_v51  ;;  %537 = vst [vmem:[#allocation7 + $0xd0] sm:$0xff] %v505_v52 }
 0x154   :  { %v309_v55 = vpop.f32.mrb[12].mxu0  ;;  %v357_v56 = vpop.f32.mrb[12].mxu1  ;;  %522 = vst [vmem:[#allocation7 + $0x58] sm:$0xff] %v490_v53  ;;  %538 = vst [vmem:[#allocation7 + $0xd8] sm:$0xff] %v506_v54 }
 0x155   :  { %v311_v57 = vpop.f32.mrb[13].mxu0  ;;  %v359_v58 = vpop.f32.mrb[13].mxu1  ;;  %v491_v59 = vadd.f32 %v793_v5, %v309_v55  ;;  %v507_v60 = vadd.f32 %v793_v5, %v357_v56 }
 0x156   :  { %v492_v61 = vadd.f32 %v795_v8, %v311_v57  ;;  %v508_v62 = vadd.f32 %v795_v8, %v359_v58 }
 0x157   :  { %523 = vst [vmem:[#allocation7 + $0x60] sm:$0xff] %v491_v59  ;;  %539 = vst [vmem:[#allocation7 + $0xe0] sm:$0xff] %v507_v60 }
 0x158   :  { %v315_v63 = vpop.f32.mrb[14].mxu0  ;;  %v363_v0 = vpop.f32.mrb[14].mxu1  ;;  %524 = vst [vmem:[#allocation7 + $0x68] sm:$0xff] %v492_v61  ;;  %540 = vst [vmem:[#allocation7 + $0xe8] sm:$0xff] %v508_v62 }
 0x159   :  { %v317_v1 = vpop.f32.mrb[15].mxu0  ;;  %v365_v2 = vpop.f32.mrb[15].mxu1  ;;  %v493_v3 = vadd.f32 %v793_v5, %v315_v63  ;;  %v509_v4 = vadd.f32 %v793_v5, %v363_v0 }
 0x15a   :  { %v494_v6 = vadd.f32 %v795_v8, %v317_v1  ;;  %v510_v7 = vadd.f32 %v795_v8, %v365_v2 }
 0x15b   :  { %525 = vst [vmem:[#allocation7 + $0x70] sm:$0xff] %v493_v3  ;;  %541 = vst [vmem:[#allocation7 + $0xf0] sm:$0xff] %v509_v4 }
 0x15c   :  { %526 = vst [vmem:[#allocation7 + $0x78] sm:$0xff] %v494_v6  ;;  %542 = vst [vmem:[#allocation7 + $0xf8] sm:$0xff] %v510_v7 }
 0x15d   :  { %718 = shalt.err (!%p715_p6)
}
 0x15e   :  { %s719_s15 = scalar_lea.hbm %s847_s3, 4096 }
 0x15f   :  { %p720_p7 = scmp.ne.s32.totalorder %s847_s3, %s719_s15  ;;  %p723_p8 = scmp.lt.u32.totalorder %s719_s15, %s847_s3 }
 0x161   :  { %p725_p9 = pnand %p723_p8, %p720_p7 }
 0x163   :  { %728 = shalt.err (!%p725_p9)
}
 0x164   :  { %554 = dma.vmem_to_hbm [thread:$0]  %s549_s11, 4096, %s847_s3, [#allocation4], %s736_s22, %s736_s22, %s737_s23  }
 0x165   :  { %733 = dma.done.wait [#allocation4], 4096  }
 0x166   :  { %734 = vsyncadd [#allocation4], 4294963200 }
 0x167   :  { %558 = vsyncpa [#allocation3], 1 }
 0x168   :  { %559 = vsyncpa [#allocation6], 1 }
 0x169   :  { %560 = vsyncpa [#allocation4], 1 }

</bundles_post_ra>
